<compile_context>
chip_gen: v5e
topology: v5e:2x2
jax: 0.10.0
libtpu: 0.0.40
codegen_flags: <defaults>
</compile_context>

<pallas_src>
import math

import jax
import jax.numpy as jnp
from jax.experimental import pallas as pl
from jax.experimental.pallas import tpu as pltpu

_LANE_CANDIDATES = (1024, 512, 256, 128)
_TARGET_BLOCK_BYTES = 2 * 1024 * 1024  # ~2 MiB/block buffer; with in+out double
                                       # buffering ~8 MiB total -> fits every
                                       # generation's default scoped VMEM.
# TODO(synk): on v6e the default scoped VMEM has headroom for 4 MiB blocks
# (~1-2% win); left at 2 MiB to avoid a v5e OOM without chip detection.


def _h_swish_kernel(x_ref, o_ref):
    x = x_ref[...]
    # h_sigmoid(x) = relu6(x + 3) / 6 ; h_swish(x) = x * h_sigmoid(x)
    hs = jnp.clip(x + 3.0, 0.0, 6.0) * (1.0 / 6.0)
    o_ref[...] = (x * hs).astype(o_ref.dtype)


def _h_swish_jnp(x):
    return (x * (jnp.clip(x + 3.0, 0.0, 6.0) * (1.0 / 6.0))).astype(x.dtype)


def _pick_lane(total):
    for lane in _LANE_CANDIDATES:
        if total % lane == 0:
            return lane
    return None


def _pick_block_rows(rows, lane, itemsize):
    """Rows per block: ~2 MiB per buffer, multiple of 32 sublanes (covers f32/
    bf16/int8 packing), and >=2-4 grid steps for mid-size inputs so the
    BlockSpec pipeline overlaps DMA with compute instead of running grid=(1,)."""
    target = max(32, (_TARGET_BLOCK_BYTES // (lane * itemsize)) // 32 * 32)
    if rows <= 32:
        return rows  # tiny input: single full-extent block (legal for any size)
    if rows < 3 * target:
        quarter = max(32, (-(-rows // 4)) // 32 * 32)
        return min(quarter, target)
    return target


def _h_swish_2d(x2d, donate):
    rows, lane = x2d.shape
    itemsize = jnp.dtype(x2d.dtype).itemsize
    block_rows = _pick_block_rows(rows, lane, itemsize)
    grid = (-(-rows // block_rows),)  # ragged last block is masked by Pallas
    total = rows * lane

    kwargs = {}
    if donate:
        # In-place update of the activation buffer (caller must not reuse x);
        # halves peak HBM footprint for this op.
        kwargs["input_output_aliases"] = {0: 0}

    return pl.pallas_call(
        _h_swish_kernel,
        out_shape=jax.ShapeDtypeStruct(x2d.shape, x2d.dtype),
        grid=grid,
        in_specs=[pl.BlockSpec((block_rows, lane), lambda i: (i, 0))],
        out_specs=pl.BlockSpec((block_rows, lane), lambda i: (i, 0)),
        compiler_params=pltpu.CompilerParams(
            # No reduction axis; "parallel" lets megacore shard row blocks.
            # TODO(synk): on v7x, verify both TensorCores receive grid steps in
            # the profile; if not, switch to pltpu.CORE_PARALLEL.
            dimension_semantics=("parallel",),
        ),
        cost_estimate=pl.CostEstimate(
            flops=5 * total,
            bytes_accessed=2 * total * itemsize,
            transcendentals=0,
        ),
        **kwargs,
    )(x2d)


def h_swish(x, *, donate_input=False):
    """Apply h_swish elementwise to a tensor of any shape via a Pallas TPU kernel."""
    orig_shape = x.shape
    total = math.prod(orig_shape)
    if total == 0:
        return x

    lane = _pick_lane(total)
    if lane is not None:
        # Free bitcast reshape to a lane-dense slab -> zero padding, zero extra
        # HBM passes. Covers every total divisible by 128.
        x2d = x.reshape(total // lane, lane)
        return _h_swish_2d(x2d, donate_input).reshape(orig_shape)

    # Rare ragged case (total not a multiple of 128): run the divisible prefix
    # through the kernel and the <128-element tail with plain jnp, instead of
    # the old full-tensor pad + slice round trips.
    flat = x.reshape(-1)
    main = (total // 128) * 128
    if main == 0:
        return _h_swish_jnp(x)  # degenerate (<128 elements total)
    lane = _pick_lane(main)
    main_out = _h_swish_2d(
        flat[:main].reshape(main // lane, lane), donate_input
    ).reshape(-1)
    tail_out = _h_swish_jnp(flat[main:])
    return jnp.concatenate([main_out, tail_out]).reshape(orig_shape)


def _h_swish_ref(x):
    return (x * (jnp.clip(x + 3.0, 0.0, 6.0) / 6.0)).astype(x.dtype)


if __name__ == "__main__":
    key = jax.random.PRNGKey(0)

    # 1) Small NCHW input consistent with the module's elementwise use.
    x = jax.random.normal(key, (2, 4, 16, 16), dtype=jnp.float32) * 4.0
    y = jax.block_until_ready(h_swish(x))
    assert y.shape == x.shape and y.dtype == x.dtype
    assert jnp.allclose(y, _h_swish_ref(x), atol=1e-6, rtol=1e-6)

    # 2) Larger input exercising the multi-block pipelined path (grid > 1).
    x2 = jax.random.normal(jax.random.PRNGKey(1), (4, 16, 128, 128), jnp.float32) * 4.0
    y2 = jax.block_until_ready(h_swish(x2))
    assert y2.shape == x2.shape and y2.dtype == x2.dtype
    assert jnp.allclose(y2, _h_swish_ref(x2), atol=1e-6, rtol=1e-6)

    # 2b) Same input with input/output aliasing enabled.
    y2d = jax.block_until_ready(h_swish(x2, donate_input=True))
    assert jnp.allclose(y2d, _h_swish_ref(x2), atol=1e-6, rtol=1e-6)

    # 3) Ragged element count (not a multiple of 128): prefix + jnp tail path.
    x3 = jax.random.normal(jax.random.PRNGKey(2), (3, 5, 7, 11), jnp.float32) * 4.0
    y3 = jax.block_until_ready(h_swish(x3))
    assert y3.shape == x3.shape and y3.dtype == x3.dtype
    assert jnp.allclose(y3, _h_swish_ref(x3), atol=1e-6, rtol=1e-6)

    # 4) bf16 activations: dtype-scaled row blocks, grid > 1.
    x4 = (jax.random.normal(jax.random.PRNGKey(3), (2, 8, 64, 64), jnp.float32) * 4.0
          ).astype(jnp.bfloat16)
    y4 = jax.block_until_ready(h_swish(x4))
    assert y4.shape == x4.shape and y4.dtype == x4.dtype
    assert jnp.allclose(y4.astype(jnp.float32),
                        _h_swish_ref(x4).astype(jnp.float32),
                        atol=2e-2, rtol=2e-2)

    print("KERNEL_OK")
</pallas_src>

<mosaic_0001>
module attributes {stable_mosaic.version = 11 : i64} {
  func.func @_h_swish_kernel(%arg0: i32, %arg1: memref<2x1024xf32, #tpu.memory_space<vmem>>, %arg2: memref<2x1024xf32, #tpu.memory_space<vmem>>) attributes {dimension_semantics = [#tpu.dimension_semantics<parallel>], iteration_bounds = array<i64: 1>, scalar_prefetch = 0 : i64, scratch_operands = 0 : i64, tpu.core_type = #tpu.core_type<tc>, window_params = [{transform_indices = @transform_0, window_bounds = array<i64: 2, 1024>}, {transform_indices = @transform_1, window_bounds = array<i64: 2, 1024>}]} {
    %c0 = arith.constant 0 : index
    %c0_0 = arith.constant 0 : index
    %0 = vector.load %arg1[%c0, %c0_0] : memref<2x1024xf32, #tpu.memory_space<vmem>>, vector<2x1024xf32>
    %cst = arith.constant 3.000000e+00 : f32
    %1 = vector.broadcast %cst : f32 to vector<2x1024xf32>
    %2 = arith.addf %0, %1 : vector<2x1024xf32>
    %cst_1 = arith.constant 0.000000e+00 : f32
    %cst_2 = arith.constant 6.000000e+00 : f32
    %3 = vector.broadcast %cst_1 : f32 to vector<2x1024xf32>
    %4 = arith.maximumf %3, %2 : vector<2x1024xf32>
    %5 = vector.broadcast %cst_2 : f32 to vector<2x1024xf32>
    %6 = arith.minimumf %5, %4 : vector<2x1024xf32>
    %cst_3 = arith.constant 0.166666672 : f32
    %7 = vector.broadcast %cst_3 : f32 to vector<2x1024xf32>
    %8 = arith.mulf %6, %7 : vector<2x1024xf32>
    %9 = arith.mulf %0, %8 : vector<2x1024xf32>
    %c0_4 = arith.constant 0 : index
    %c0_5 = arith.constant 0 : index
    %10 = vector.load %arg2[%c0_4, %c0_5] : memref<2x1024xf32, #tpu.memory_space<vmem>>, vector<2x1024xf32>
    tpu.vector_store %arg2[%c0_4, %c0_5], %9 {strides = array<i32>} : memref<2x1024xf32, #tpu.memory_space<vmem>>, vector<2x1024xf32>,
    return
  }
  func.func @transform_0(%arg0: i32) -> (i32, i32) {
    %c0_i32 = arith.constant 0 : i32
    %c0_i32_0 = arith.constant 0 : i32
    return %arg0, %c0_i32 : i32, i32
  }
  func.func @transform_1(%arg0: i32) -> (i32, i32) {
    %c0_i32 = arith.constant 0 : i32
    %c0_i32_0 = arith.constant 0 : i32
    return %arg0, %c0_i32 : i32, i32
  }
}

</mosaic_0001>

<bundles_post_ra>
// kernel: tpu_custom_call.1
= control target key start
LH: loop header
LB: loop body
LE: loop exit
PB: predicated region body
PF: predicated region fallthrough
CT: control target
= control target key end

     0   :  { %6 = vsyncpa [#allocation3], 0  ;;  %s126_s0 = inlined_call_operand.hbm [shape: f32[2,1024], index: 0, kind: input, shape index: {}]   ;;  %s127_s1 = inlined_call_operand.hbm [shape: f32[2,1024], index: 1, kind: output, shape index: {}]  }
   0x1   :  { %7 = vsyncpa [#allocation4], 0  ;;  %s13_s8 = sshll.u32 %s126_s0, 4  ;;  %s108_s9 = smov [#allocation2]   ;;  %s14_s8 = int_to_ptr.hbm [resolvable:$true] %s13_s8 }
   0x2   :  { %s15_s10 = sshll.u32 %s108_s9, 4  ;;  %s16_s10 = int_to_ptr.vmem [resolvable:$true] %s15_s10 }
   0x3   :  { %18 = dma.hbm_to_vmem [thread:$0]  %s14_s8, 256, %s16_s10, [#allocation3]  }
   0x4   :  { %104 = dma.done.wait [#allocation3], 256  }
   0x5   :  { %105 = vsyncadd [#allocation3], 4294967040  ;;  %v23_v0 = vld [vmem:[#allocation2] sm:$0xff]  ;;  %v24_v1 = vld [vmem:[#allocation2 + $0x8] sm:$0xff]  ;;  %s109_s11 = smov [#allocation5]   ;;  %s44_s14 = sshll.u32 %s127_s1, 4  ;;  %s45_s14 = int_to_ptr.hbm [resolvable:$true] %s44_s14 }
   0x6   :  { %v25_v2 = vadd.f32 3.0, %v23_v0  ;;  %v26_v3 = vadd.f32 3.0, %v24_v1  ;;  %s42_s12 = sshll.u32 %s109_s11, 4  ;;  %s43_s12 = int_to_ptr.vmem [resolvable:$true] %s42_s12 }
   0x8   :  { %v27_v4 = vmax.f32 %v25_v2, 0.0  ;;  %v28_v5 = vmax.f32 %v26_v3, 0.0 }
   0xa   :  { %v29_v6 = vmin.f32 %v27_v4, 6.0  ;;  %v30_v7 = vmin.f32 %v28_v5, 6.0 }
   0xc   :  { %v31_v8 = vmul.f32 0.16666667, %v29_v6  ;;  %v32_v9 = vmul.f32 0.16666667, %v30_v7 }
   0xe   :  { %v33_v10 = vmul.f32 %v31_v8, %v23_v0  ;;  %v34_v11 = vmul.f32 %v32_v9, %v24_v1 }
  0x10   :  { %35 = vst [vmem:[#allocation5] sm:$0xff] %v33_v10 }
  0x11   :  { %36 = vst [vmem:[#allocation5 + $0x8] sm:$0xff] %v34_v11 }
  0x12   :  { %47 = dma.vmem_to_hbm [thread:$0]  %s43_s12, 256, %s45_s14, [#allocation4]  }
  0x13   :  { %106 = dma.done.wait [#allocation4], 256  }
  0x14   :  { %107 = vsyncadd [#allocation4], 4294967040 }
  0x15   :  { %52 = vsyncpa [#allocation3], 1 }
  0x16   :  { %53 = vsyncpa [#allocation4], 1 }

</bundles_post_ra>
